<compile_context>
chip_gen: v6e
topology: v6e:2x2x1
jax: 0.10.0
libtpu: 0.0.40
codegen_flags: <defaults>
</compile_context>

<pallas_src>
import jax
import jax.numpy as jnp
from jax.experimental import pallas as pl
from jax.experimental.pallas import tpu as pltpu

H1, H2 = 256, 128       # hidden widths (match the PyTorch module)


def _round_up(n, m):
    return ((n + m - 1) // m) * m


def _cdiv(a, b):
    return (a + b - 1) // b


def _choose_tile(B, tile_b_max):
    """Pick (TILE_B, B_pad).

    * B <= 512: single tile == B (no padding at all; latency regime).
    * B  > 512: >=2 grid steps (megacore on v7x), remainder-aware tile size so
      padding is at most 7 rows beyond the last partial tile.
    """
    if B <= 512:
        return B, B
    n_tiles = max(2, _cdiv(B, tile_b_max))
    tile = _round_up(_cdiv(B, n_tiles), 8)
    n_tiles = _cdiv(B, tile)
    return tile, n_tiles * tile


def pokenet_kernel(x_ref, w1_ref, b1_ref, w2_ref, b2_ref, w3_ref, b3_ref, o_ref):
    # In-kernel f32 -> bf16 cast of the activation tile (hidden under the x DMA).
    x = x_ref[...].astype(jnp.bfloat16)
    # Layer 1: bf16 matmul on MXU, f32 accumulate; bias + ReLU on f32.
    h1 = jnp.dot(x, w1_ref[...], preferred_element_type=jnp.float32)
    h1 = jnp.maximum(h1 + b1_ref[...], 0.0)
    # Layer 2
    h2 = jnp.dot(h1.astype(jnp.bfloat16), w2_ref[...],
                 preferred_element_type=jnp.float32)
    h2 = jnp.maximum(h2 + b2_ref[...], 0.0)
    # Layer 3 (narrow output; block last dim == full array dim)
    out = jnp.dot(h2.astype(jnp.bfloat16), w3_ref[...],
                  preferred_element_type=jnp.float32)
    o_ref[...] = (out + b3_ref[...]).astype(o_ref.dtype)


def prepare_params(params):
    """One-time (out-of-forward-path) parameter prep: bf16 weights, f32 biases."""
    return {
        "w1": params["w1"].astype(jnp.bfloat16),
        "w2": params["w2"].astype(jnp.bfloat16),
        "w3": params["w3"].astype(jnp.bfloat16),
        "b1": params["b1"].astype(jnp.float32).reshape(1, -1),
        "b2": params["b2"].astype(jnp.float32).reshape(1, -1),
        "b3": params["b3"].astype(jnp.float32).reshape(1, -1),
    }


def pokenet_forward(x, prepped, *, tile_b_max=2048):
    """x: [B, state_dim] f32; prepped: output of prepare_params (bf16 weights
    [in,out], f32 biases [1,out]).  Computes ReLU(ReLU(x@W1+b1)@W2+b2)@W3+b3."""
    B, state_dim = x.shape
    action_dim = prepped["w3"].shape[1]

    TILE_B, B_pad = _choose_tile(B, tile_b_max)
    x_p = jnp.pad(x, ((0, B_pad - B), (0, 0))) if B_pad != B else x

    w1, w2, w3 = prepped["w1"], prepped["w2"], prepped["w3"]
    b1, b2, b3 = prepped["b1"], prepped["b2"], prepped["b3"]

    grid = (B_pad // TILE_B,)
    const2 = lambda i: (0, 0)   # weights/biases: same block every step -> VMEM-resident

    in_specs = [
        pl.BlockSpec((TILE_B, state_dim), lambda i: (i, 0)),  # x tile (f32)
        pl.BlockSpec((state_dim, H1), const2),                # w1
        pl.BlockSpec((1, H1), const2),                        # b1
        pl.BlockSpec((H1, H2), const2),                       # w2
        pl.BlockSpec((1, H2), const2),                        # b2
        pl.BlockSpec((H2, action_dim), const2),               # w3 (unpadded, narrow)
        pl.BlockSpec((1, action_dim), const2),                # b3
    ]
    out_specs = pl.BlockSpec((TILE_B, action_dim), lambda i: (i, 0))

    flops = 2 * B_pad * (state_dim * H1 + H1 * H2 + H2 * action_dim)
    bytes_accessed = (
        B_pad * state_dim * 4 + B_pad * action_dim * 4
        + (w1.size + w2.size + w3.size) * 2
        + (b1.size + b2.size + b3.size) * 4
    )

    # Per-step VMEM estimate (double-buffered x/out, resident weights, f32/bf16
    # intermediates); clamp so large tiles also fit v5e's 16 MiB scoped default.
    vmem_est = (
        2 * TILE_B * state_dim * 4
        + 2 * TILE_B * action_dim * 4
        + 2 * 2 * (state_dim * H1 + H1 * H2 + H2 * action_dim)
        + 6 * TILE_B * (H1 + H2)
    )
    vmem_limit = int(min(max(2 * vmem_est, 32 << 20), 48 << 20))

    out = pl.pallas_call(
        pokenet_kernel,
        out_shape=jax.ShapeDtypeStruct((B_pad, action_dim), jnp.float32),
        grid=grid,
        in_specs=in_specs,
        out_specs=out_specs,
        compiler_params=pltpu.CompilerParams(
            dimension_semantics=("parallel",),
            vmem_limit_bytes=vmem_limit),
        cost_estimate=pl.CostEstimate(
            flops=flops, transcendentals=0, bytes_accessed=bytes_accessed),
    )(x_p, w1, b1, w2, b2, w3, b3)

    return out[:B] if B_pad != B else out


def init_params(key, state_dim, action_dim):
    """Deterministic synthetic parameters (PyTorch-like uniform fan-in init)."""
    def linear(key, fan_in, fan_out):
        kw, kb = jax.random.split(key)
        bound = 1.0 / jnp.sqrt(fan_in)
        w = jax.random.uniform(kw, (fan_in, fan_out), jnp.float32, -bound, bound)
        b = jax.random.uniform(kb, (1, fan_out), jnp.float32, -bound, bound)
        return w, b

    k1, k2, k3 = jax.random.split(key, 3)
    w1, b1 = linear(k1, state_dim, H1)
    w2, b2 = linear(k2, H1, H2)
    w3, b3 = linear(k3, H2, action_dim)
    return {"w1": w1, "b1": b1, "w2": w2, "b2": b2, "w3": w3, "b3": b3}


def pokenet_reference(x, p):
    h1 = jnp.maximum(x @ p["w1"] + p["b1"], 0.0)
    h2 = jnp.maximum(h1 @ p["w2"] + p["b2"], 0.0)
    return h2 @ p["w3"] + p["b3"]


if __name__ == "__main__":
    key = jax.random.PRNGKey(0)
    kx, kx2, kp = jax.random.split(key, 3)

    state_dim, action_dim = 32, 8
    params = init_params(kp, state_dim, action_dim)
    prepped = prepare_params(params)   # one-time prep, outside the forward path

    # Small-batch (RL inference) case: single tile, no padding.
    batch = 2
    x = jax.random.normal(kx, (batch, state_dim), jnp.float32)
    out = jax.block_until_ready(pokenet_forward(x, prepped))
    ref = pokenet_reference(x, params)
    assert out.shape == (batch, action_dim)
    # bf16 matmul operands -> relaxed tolerance vs. the f32 reference.
    assert jnp.allclose(out, ref, atol=5e-2, rtol=5e-2)

    # Multi-tile case: exercises remainder-aware tiling + 2-step parallel grid.
    batch2 = 1037
    x2 = jax.random.normal(kx2, (batch2, state_dim), jnp.float32)
    out2 = jax.block_until_ready(pokenet_forward(x2, prepped, tile_b_max=2048))
    ref2 = pokenet_reference(x2, params)
    assert out2.shape == (batch2, action_dim)
    assert jnp.allclose(out2, ref2, atol=5e-2, rtol=5e-2)

    print("KERNEL_OK")
</pallas_src>

<mosaic_0001>
module attributes {stable_mosaic.version = 11 : i64} {
  func.func @pokenet_kernel(%arg0: i32, %arg1: memref<2x32xf32, #tpu.memory_space<vmem>>, %arg2: memref<32x256xbf16, #tpu.memory_space<vmem>>, %arg3: memref<1x256xf32, #tpu.memory_space<vmem>>, %arg4: memref<256x128xbf16, #tpu.memory_space<vmem>>, %arg5: memref<1x128xf32, #tpu.memory_space<vmem>>, %arg6: memref<128x8xbf16, #tpu.memory_space<vmem>>, %arg7: memref<1x8xf32, #tpu.memory_space<vmem>>, %arg8: memref<2x8xf32, #tpu.memory_space<vmem>>) attributes {dimension_semantics = [#tpu.dimension_semantics<parallel>], iteration_bounds = array<i64: 1>, scalar_prefetch = 0 : i64, scratch_operands = 0 : i64, tpu.core_type = #tpu.core_type<tc>, window_params = [{transform_indices = @transform_0, window_bounds = array<i64: 2, 32>}, {pipeline_mode = #tpu.pipeline_mode<synchronous>, transform_indices = @transform_1, window_bounds = array<i64: 32, 256>}, {pipeline_mode = #tpu.pipeline_mode<synchronous>, transform_indices = @transform_2, window_bounds = array<i64: 1, 256>}, {pipeline_mode = #tpu.pipeline_mode<synchronous>, transform_indices = @transform_3, window_bounds = array<i64: 256, 128>}, {pipeline_mode = #tpu.pipeline_mode<synchronous>, transform_indices = @transform_4, window_bounds = array<i64: 1, 128>}, {pipeline_mode = #tpu.pipeline_mode<synchronous>, transform_indices = @transform_5, window_bounds = array<i64: 128, 8>}, {pipeline_mode = #tpu.pipeline_mode<synchronous>, transform_indices = @transform_6, window_bounds = array<i64: 1, 8>}, {transform_indices = @transform_7, window_bounds = array<i64: 2, 8>}]} {
    %c0 = arith.constant 0 : index
    %c0_0 = arith.constant 0 : index
    %0 = vector.load %arg1[%c0, %c0_0] : memref<2x32xf32, #tpu.memory_space<vmem>>, vector<2x32xf32>
    %1 = arith.truncf %0 : vector<2x32xf32> to vector<2x32xbf16>
    %c0_1 = arith.constant 0 : index
    %c0_2 = arith.constant 0 : index
    %2 = vector.load %arg2[%c0_1, %c0_2] : memref<32x256xbf16, #tpu.memory_space<vmem>>, vector<32x256xbf16>
    %cst = arith.constant dense<0.000000e+00> : vector<2x256xf32>
    %3 = tpu.matmul %1, %2, %cst {dimension_numbers = #tpu.dot_dimension_numbers<[1], [0], [0], [1], [0, 0, 1, 1], [], []>} : vector<2x32xbf16>, vector<32x256xbf16>, vector<2x256xf32> -> vector<2x256xf32>
    %c0_3 = arith.constant 0 : index
    %c0_4 = arith.constant 0 : index
    %4 = vector.load %arg3[%c0_3, %c0_4] : memref<1x256xf32, #tpu.memory_space<vmem>>, vector<1x256xf32>
    %5 = vector.broadcast %4 : vector<1x256xf32> to vector<2x256xf32>
    %6 = arith.addf %3, %5 : vector<2x256xf32>
    %cst_5 = arith.constant 0.000000e+00 : f32
    %7 = vector.broadcast %cst_5 : f32 to vector<2x256xf32>
    %8 = arith.maximumf %6, %7 : vector<2x256xf32>
    %9 = arith.truncf %8 : vector<2x256xf32> to vector<2x256xbf16>
    %c0_6 = arith.constant 0 : index
    %c0_7 = arith.constant 0 : index
    %10 = vector.load %arg4[%c0_6, %c0_7] : memref<256x128xbf16, #tpu.memory_space<vmem>>, vector<256x128xbf16>
    %cst_8 = arith.constant dense<0.000000e+00> : vector<2x128xf32>
    %11 = tpu.matmul %9, %10, %cst_8 {dimension_numbers = #tpu.dot_dimension_numbers<[1], [0], [0], [1], [0, 0, 1, 1], [], []>} : vector<2x256xbf16>, vector<256x128xbf16>, vector<2x128xf32> -> vector<2x128xf32>
    %c0_9 = arith.constant 0 : index
    %c0_10 = arith.constant 0 : index
    %12 = vector.load %arg5[%c0_9, %c0_10] : memref<1x128xf32, #tpu.memory_space<vmem>>, vector<1x128xf32>
    %13 = vector.broadcast %12 : vector<1x128xf32> to vector<2x128xf32>
    %14 = arith.addf %11, %13 : vector<2x128xf32>
    %cst_11 = arith.constant 0.000000e+00 : f32
    %15 = vector.broadcast %cst_11 : f32 to vector<2x128xf32>
    %16 = arith.maximumf %14, %15 : vector<2x128xf32>
    %17 = arith.truncf %16 : vector<2x128xf32> to vector<2x128xbf16>
    %c0_12 = arith.constant 0 : index
    %c0_13 = arith.constant 0 : index
    %18 = vector.load %arg6[%c0_12, %c0_13] : memref<128x8xbf16, #tpu.memory_space<vmem>>, vector<128x8xbf16>
    %cst_14 = arith.constant dense<0.000000e+00> : vector<2x8xf32>
    %19 = tpu.matmul %17, %18, %cst_14 {dimension_numbers = #tpu.dot_dimension_numbers<[1], [0], [0], [1], [0, 0, 1, 1], [], []>} : vector<2x128xbf16>, vector<128x8xbf16>, vector<2x8xf32> -> vector<2x8xf32>
    %c0_15 = arith.constant 0 : index
    %c0_16 = arith.constant 0 : index
    %20 = vector.load %arg7[%c0_15, %c0_16] : memref<1x8xf32, #tpu.memory_space<vmem>>, vector<1x8xf32>
    %21 = vector.broadcast %20 : vector<1x8xf32> to vector<2x8xf32>
    %22 = arith.addf %19, %21 : vector<2x8xf32>
    %c0_17 = arith.constant 0 : index
    %c0_18 = arith.constant 0 : index
    %23 = vector.load %arg8[%c0_17, %c0_18] : memref<2x8xf32, #tpu.memory_space<vmem>>, vector<2x8xf32>
    tpu.vector_store %arg8[%c0_17, %c0_18], %22 {strides = array<i32>} : memref<2x8xf32, #tpu.memory_space<vmem>>, vector<2x8xf32>,
    return
  }
  func.func @transform_0(%arg0: i32) -> (i32, i32) {
    %c0_i32 = arith.constant 0 : i32
    %c0_i32_0 = arith.constant 0 : i32
    return %arg0, %c0_i32 : i32, i32
  }
  func.func @transform_1(%arg0: i32) -> (i32, i32) {
    %c0_i32 = arith.constant 0 : i32
    %c0_i32_0 = arith.constant 0 : i32
    %c0_i32_1 = arith.constant 0 : i32
    return %c0_i32, %c0_i32_0 : i32, i32
  }
  func.func @transform_2(%arg0: i32) -> (i32, i32) {
    %c0_i32 = arith.constant 0 : i32
    %c0_i32_0 = arith.constant 0 : i32
    %c0_i32_1 = arith.constant 0 : i32
    return %c0_i32, %c0_i32_0 : i32, i32
  }
  func.func @transform_3(%arg0: i32) -> (i32, i32) {
    %c0_i32 = arith.constant 0 : i32
    %c0_i32_0 = arith.constant 0 : i32
    %c0_i32_1 = arith.constant 0 : i32
    return %c0_i32, %c0_i32_0 : i32, i32
  }
  func.func @transform_4(%arg0: i32) -> (i32, i32) {
    %c0_i32 = arith.constant 0 : i32
    %c0_i32_0 = arith.constant 0 : i32
    %c0_i32_1 = arith.constant 0 : i32
    return %c0_i32, %c0_i32_0 : i32, i32
  }
  func.func @transform_5(%arg0: i32) -> (i32, i32) {
    %c0_i32 = arith.constant 0 : i32
    %c0_i32_0 = arith.constant 0 : i32
    %c0_i32_1 = arith.constant 0 : i32
    return %c0_i32, %c0_i32_0 : i32, i32
  }
  func.func @transform_6(%arg0: i32) -> (i32, i32) {
    %c0_i32 = arith.constant 0 : i32
    %c0_i32_0 = arith.constant 0 : i32
    %c0_i32_1 = arith.constant 0 : i32
    return %c0_i32, %c0_i32_0 : i32, i32
  }
  func.func @transform_7(%arg0: i32) -> (i32, i32) {
    %c0_i32 = arith.constant 0 : i32
    %c0_i32_0 = arith.constant 0 : i32
    return %arg0, %c0_i32 : i32, i32
  }
}

</mosaic_0001>

<bundles_post_ra>
// kernel: tpu_custom_call.1
= control target key start
LH: loop header
LB: loop body
LE: loop exit
PB: predicated region body
PF: predicated region fallthrough
CT: control target
= control target key end

     0   :  { %12 = vsyncpa [#allocation3], 0  ;;  %s698_s0 = inlined_call_operand.vmem [shape: f32[2,32], index: 0, kind: input, shape index: {}]   ;;  %s699_s1 = inlined_call_operand.vmem [shape: bf16[32,256], index: 1, kind: input, shape index: {}]   ;;  %s700_s2 = inlined_call_operand.vmem [shape: f32[1,256], index: 2, kind: input, shape index: {}]   ;;  %s701_s3 = inlined_call_operand.hbm [shape: bf16[256,128], index: 3, kind: input, shape index: {}]   ;;  %s702_s4 = inlined_call_operand.vmem [shape: f32[1,128], index: 4, kind: input, shape index: {}]   ;;  %s703_s5 = inlined_call_operand.vmem [shape: bf16[128,8], index: 5, kind: input, shape index: {}]   ;;  %s704_s6 = inlined_call_operand.vmem [shape: f32[1,8], index: 6, kind: input, shape index: {}]   ;;  %s705_s7 = inlined_call_operand.hbm [shape: f32[2,8], index: 7, kind: output, shape index: {}]  }
   0x1   :  { %13 = vsyncpa [#allocation4], 0  ;;  %s597_s24 = smov [#allocation2]  }
   0x2   :  { %s25_s25 = sshll.u32 %s597_s24, 4  ;;  %s26_s25 = int_to_ptr.vmem [resolvable:$true] %s25_s25 }
   0x3   :  { %s561_s26 = scalar_lea.vmem %s26_s25, 2048  ;;  %p566_p1 = scmp.lt.s32.totalorder %s26_s25, %s26_s25 }
   0x4   :  { %p562_p0 = scmp.ne.s32.totalorder %s26_s25, %s561_s26  ;;  %p567_p2 = scmp.lt.s32.totalorder %s561_s26, %s561_s26 }
   0x6   :  { %p568_p3 = por %p567_p2, %p566_p1 }
   0x8   :  { %p569_p4 = pnand %p568_p3, %p562_p0 }
   0xa   :  { %572 = shalt.err (!%p569_p4)
}
   0xb   :  { %s598_s27 = smov 64   ;;  %s599_s28 = smov 4  }
   0xc   :  { %31 = dma.hbm_to_vmem [thread:$0]  %s701_s3, 2048, %s26_s25, [#allocation3], %s598_s27, %s598_s27, %s599_s28  }
   0xd   :  { %593 = dma.done.wait [#allocation3], 2048  }
   0xe   :  { %594 = vsyncadd [#allocation3], 4294965248  ;;  %v600_v0 = vmov 0   ;;  %v523_v1 = vld [vmem:[%s699_s1 + $0x14] ss:$8 sps:$4 sm:$0xff]   ;;  %vm80_vm0 = vcmask 261120   ;;  %v50_v29 = vlaneseq }
   0xf   :  { %116 = vmatprep.mubr.bf16.mxu0 %v600_v0  ;;  %v525_v2 = vld [vmem:[%s699_s1 + $0x10] ss:$8 sps:$4 sm:$0xff]   ;;  %96 = vmatprep.subr.bf16.mxu0 %v523_v1  ;;  %v526_v3 = vld [vmem:[%s699_s1 + $0x4] ss:$8 sps:$4 sm:$0xff]   ;;  %v528_v4 = vld [vmem:[%s699_s1] ss:$8 sps:$4 sm:$0xff]  }
  0x10   :  { %v42_v5 = vld [vmem:[%s698_s0] sm:$0x3]  ;;  %97 = vmatpush1.bf16.msra.mxu0 %v525_v2  ;;  %v529_v6 = vld [vmem:[#allocation2 + $0x78] sm:$0xff]   ;;  %v531_v8 = vld [vmem:[#allocation2 + $0x70] sm:$0xff]   ;;  %v601_v24 = vmov 0.0   ;;  %v51_v30 = vshrl.u32 %v50_v29, 7 }
  0x11   :  { %98 = vmatprep.subr.bf16.mxu0 %v526_v3  ;;  %v530_v7 = vld [vmem:[#allocation2 + $0x38] sm:$0xff]   ;;  %465 = vmatprep.subr.bf16.mxu1 %v529_v6  ;;  %v43_v9 = vpack.c.bf16 %v42_v5, %v42_v5  ;;  %v532_v10 = vld [vmem:[#allocation2 + $0x30] sm:$0xff]   ;;  %v533_v11 = vld [vmem:[#allocation2 + $0x68] sm:$0xff]   ;;  %vm602_vm1 = vmmov 0   ;;  %vm417_vm2 = vcmask 58368  }
  0x12   :  { %466 = vmatpush3.bf16.msra.mxu1 %v530_v7  ;;  %v534_v12 = vld [vmem:[#allocation2 + $0x28] sm:$0xff]   ;;  %v535_v13 = vld [vmem:[#allocation2 + $0x60] sm:$0xff]   ;;  %v537_v15 = vld [vmem:[#allocation2 + $0x58] sm:$0xff]   ;;  %v52_v31 = vsub.s32 0, %v51_v30  ;;  %v56_v33 = vsub.s32 1, %v51_v30 }
  0x13   :  { %467 = vmatprep.subr.bf16.mxu1 %v531_v8  ;;  %v536_v14 = vld [vmem:[#allocation2 + $0x20] sm:$0xff]   ;;  %v538_v16 = vld [vmem:[#allocation2 + $0x18] sm:$0xff]   ;;  %v539_v17 = vld [vmem:[#allocation2 + $0x50] sm:$0xff]  }
  0x14   :  { %99 = vmatpush1.bf16.msra.mxu0 %v528_v4  ;;  %v540_v18 = vld [vmem:[#allocation2 + $0x10] sm:$0xff]   ;;  %v541_v19 = vld [vmem:[#allocation2 + $0x48] sm:$0xff]   ;;  %v543_v21 = vld [vmem:[#allocation2 + $0x40] sm:$0xff]  }
  0x15   :  { %v542_v20 = vld [vmem:[#allocation2 + $0x8] sm:$0xff]   ;;  %v544_v22 = vld [vmem:[#allocation2] sm:$0xff]   ;;  %v545_v23 = vld [vmem:[%s703_s5 + $0x38] sm:$0xff]   ;;  %496 = vmatprep.subr.bf16.mxu0 %v601_v24 }
  0x16   :  { %468 = vmatpush3.bf16.msra.mxu1 %v532_v10  ;;  %v546_v25 = vld [vmem:[%s703_s5 + $0x30] sm:$0xff]   ;;  %v547_v26 = vld [vmem:[%s703_s5 + $0x28] sm:$0xff]   ;;  %v548_v27 = vld [vmem:[%s703_s5 + $0x20] sm:$0xff]  }
  0x17   :  { %438 = vmatmul.mubr.msk.bf16.vlgmr.msra.gmra.mxu0 %vm80_vm0, %v43_v9  ;;  %469 = vmatprep.subr.bf16.mxu1 %v533_v11  ;;  %v549_v28 = vld [vmem:[%s703_s5 + $0x18] sm:$0xff]   ;;  %v48_v32 = vld [vmem:[%s700_s2] sm:$0x3]  ;;  %v550_v46 = vld [vmem:[%s703_s5 + $0x10] sm:$0xff]  }
  0x18   :  { %497 = vmatpush3.bf16.msra.mxu0 %v545_v23  ;;  %v53_v34 = vrot.slane %v48_v32, %v52_v31  ;;  %v57_v35 = vrot.slane %v48_v32, %v56_v33  ;;  %v551_v47 = vld [vmem:[%s703_s5 + $0x8] sm:$0xff]   ;;  %v552_v48 = vld [vmem:[%s703_s5] sm:$0xff]   ;;  %512 = vmatprep.mubr.msk.bf16.mxu0 %vm602_vm1, %v601_v24  ;;  %s603_s5 = smov [#allocation5]  }
  0x19   :  { %498 = vmatprep.subr.bf16.mxu0 %v601_v24  ;;  %v439_v50 = vld [vmem:[%s702_s4] ss:$0 sm:$0xff]  ;;  %s425_s13 = sshll.u32 %s603_s5, 4  ;;  %s426_s13 = int_to_ptr.vmem [resolvable:$true] %s425_s13 }
  0x1a   :  { %470 = vmatpush3.bf16.msra.mxu1 %v534_v12  ;;  %v456_v58 = vld [vmem:[%s704_s6] ss:$0 sm:$0xff]  ;;  %s573_s4 = scalar_lea.vmem %s426_s13, 32  ;;  %p578_p6 = scmp.lt.s32.totalorder %s426_s13, %s426_s13 }
  0x1b   :  { %471 = vmatprep.subr.bf16.mxu1 %v535_v13  ;;  %p574_p5 = scmp.ne.s32.totalorder %s426_s13, %s573_s4  ;;  %p579_p7 = scmp.lt.s32.totalorder %s573_s4, %s573_s4 }
  0x1c   :  { %499 = vmatpush3.bf16.msra.mxu0 %v546_v25 }
  0x1d   :  { %500 = vmatprep.subr.bf16.mxu0 %v601_v24  ;;  %p580_p8 = por %p579_p7, %p578_p6 }
  0x1e   :  { %472 = vmatpush3.bf16.msra.mxu1 %v536_v14 }
  0x1f   :  { %473 = vmatprep.subr.bf16.mxu1 %v537_v15  ;;  %p581_p9 = pnand %p580_p8, %p574_p5 }
  0x20   :  { %501 = vmatpush3.bf16.msra.mxu0 %v547_v26 }
  0x21   :  { %502 = vmatprep.subr.bf16.mxu0 %v601_v24 }
  0x22   :  { %474 = vmatpush3.bf16.msra.mxu1 %v538_v16 }
  0x23   :  { %475 = vmatprep.subr.bf16.mxu1 %v539_v17 }
  0x24   :  { %503 = vmatpush3.bf16.msra.mxu0 %v548_v27 }
  0x25   :  { %504 = vmatprep.subr.bf16.mxu0 %v601_v24 }
  0x26   :  { %476 = vmatpush3.bf16.msra.mxu1 %v540_v18 }
  0x27   :  { %477 = vmatprep.subr.bf16.mxu1 %v541_v19 }
  0x28   :  { %505 = vmatpush3.bf16.msra.mxu0 %v549_v28 }
  0x29   :  { %506 = vmatprep.subr.bf16.mxu0 %v601_v24 }
  0x2a   :  { %478 = vmatpush3.bf16.msra.mxu1 %v542_v20 }
  0x2b   :  { %479 = vmatprep.subr.bf16.mxu1 %v543_v21 }
  0x2c   :  { %507 = vmatpush3.bf16.msra.mxu0 %v550_v46 }
  0x2d   :  { %508 = vmatprep.subr.bf16.mxu0 %v601_v24 }
  0x2e   :  { %480 = vmatpush3.bf16.msra.mxu1 %v544_v22 }
  0x30   :  { %509 = vmatpush3.bf16.msra.mxu0 %v551_v47 }
  0x31   :  { %510 = vmatprep.subr.bf16.mxu0 %v601_v24 }
  0x34   :  { %511 = vmatpush3.bf16.msra.mxu0 %v552_v48 }
  0xd7   :  { %v118_v36 = vpop.f32.mrf.mxu0 }
  0xd8   :  { %v119_v37 = vadd.f32 %v118_v36, %v53_v34 }
  0xd9   :  { %v120_v38 = vpop.f32.mrf.mxu0 }
  0xda   :  { %v121_v39 = vadd.f32 %v120_v38, %v57_v35  ;;  %v125_v40 = vmax.f32 %v119_v37, 0.0 }
  0xdb   :  { %v122_v41 = vpop.f32.mrf.mxu0 }
  0xdc   :  { %v126_v42 = vmax.f32 %v121_v39, 0.0  ;;  %v127_v45 = vpack.c.bf16 %v125_v40, %v125_v40 }
  0xdd   :  { %v123_v43 = vpop.f32.mrf.mxu0 }
  0xde   :  { %v128_v44 = vpack.c.bf16 %v126_v42, %v126_v42 }
  0xe0   :  { %296 = vmatprep.mubr.bf16.mxu1 %v128_v44 }
  0xe1   :  { %297 = vmatmul.mubr.bf16.vlgmr.msra.gmra.mxu1 %v127_v45 }
 0x1a1   :  { %v481_v49 = vpop.f32.mrf.mxu1 }
 0x1a3   :  { %v482_v51 = vpop.f32.mrf.mxu1 }
 0x1a4   :  { %v483_v52 = vadd.f32 %v482_v51, %v481_v49 }
 0x1a5   :  { %v484_v53 = vpop.f32.mrf.mxu1 }
 0x1a6   :  { %v299_v54 = vadd.f32 %v483_v52, %v439_v50 }
 0x1a7   :  { %v485_v55 = vpop.f32.mrf.mxu1 }
 0x1a8   :  { %v304_v56 = vmax.f32 %v299_v54, 0.0 }
 0x1aa   :  { %v305_v57 = vpack.c.bf16 %v304_v56, %v304_v56 }
 0x1ac   :  { %513 = vmatmul.mubr.bf16.vlgmr.msra.gmra.mxu0 %v305_v57 }
 0x26c   :  { %v411_v59 = vpop.f32.mrf.mxu0 }
 0x26d   :  { %v412_v60 = vadd.f32 %v456_v58, %v411_v59 }
 0x26e   :  { %v514_v61 = vpop.f32.mrf.mxu0 }
 0x26f   :  { %418 = vst.msk [vmem:[#allocation5] sm:$0x3] %vm417_vm2, %v412_v60 }
 0x270   :  { %v414_v62 = vpop.f32.mrf.mxu0 }
 0x271   :  { %584 = shalt.err (!%p581_p9)
}
 0x272   :  { %428 = dma.vmem_to_hbm [thread:$0]  %s426_s13, 32, %s705_s7, [#allocation4]   ;;  %v515_v63 = vpop.f32.mrf.mxu0 }
 0x273   :  { %595 = dma.done.wait [#allocation4], 32  }
 0x274   :  { %596 = vsyncadd [#allocation4], 4294967264 }
 0x275   :  { %432 = vsyncpa [#allocation3], 1 }
 0x276   :  { %433 = vsyncpa [#allocation4], 1 }

</bundles_post_ra>
